<compile_context>
chip_gen: v6e
topology: v6e:2x2x1
jax: 0.10.0
libtpu: 0.0.40
codegen_flags: <defaults>
</compile_context>

<pallas_src>
import functools

import jax
import jax.numpy as jnp
from jax.experimental import pallas as pl
from jax.experimental.pallas import tpu as pltpu


_LANE = 128
_SUBLANE = 8
# Per-input VMEM tile budget (bytes). Safe on every TPU generation.
_DEFAULT_TILE_BYTES = 2 * 1024 * 1024


def _round_up(x, m):
    return ((x + m - 1) // m) * m


def _round_down(x, m):
    return (x // m) * m


def _xcorr2_kernel(x1_ref, x2_ref, o_ref, *acc_refs,
                   zero_mean_normalized, eps, inv_n):
    # x*_ref : (TB, TW) tile of the flattened (B_pad, N_pad) inputs.
    # o_ref  : (TB, 1) per-row scores (written on the last H*W chunk).
    # acc_refs: per-row partial-sum accumulators, persistent across the
    #           "arbitrary" chunk axis.
    k = pl.program_id(1)

    @pl.when(k == 0)
    def _init():
        for r in acc_refs:
            r[...] = jnp.zeros_like(r)

    x1 = x1_ref[...].astype(jnp.float32)
    x2 = x2_ref[...].astype(jnp.float32)

    if zero_mean_normalized:
        s12_ref, s1_ref, s2_ref, s11_ref, s22_ref = acc_refs
        s12_ref[...] += jnp.sum(x1 * x2, axis=1, keepdims=True)
        s1_ref[...] += jnp.sum(x1, axis=1, keepdims=True)
        s2_ref[...] += jnp.sum(x2, axis=1, keepdims=True)
        s11_ref[...] += jnp.sum(x1 * x1, axis=1, keepdims=True)
        s22_ref[...] += jnp.sum(x2 * x2, axis=1, keepdims=True)
    else:
        (s12_ref,) = acc_refs
        s12_ref[...] += jnp.sum(x1 * x2, axis=1, keepdims=True)

    @pl.when(k == pl.num_programs(1) - 1)
    def _finalize():
        if zero_mean_normalized:
            # Single-pass algebraic InstanceNorm'd cross-correlation:
            #   sum((x1-m1)(x2-m2))/n = s12/n - m1*m2
            #   var_i = s_ii/n - m_i^2   (biased, matches InstanceNorm2d)
            m1 = s1_ref[...] * inv_n
            m2 = s2_ref[...] * inv_n
            v1 = s11_ref[...] * inv_n - m1 * m1
            v2 = s22_ref[...] * inv_n - m2 * m2
            cov = s12_ref[...] * inv_n - m1 * m2
            o_ref[...] = cov * jax.lax.rsqrt(v1 + eps) * jax.lax.rsqrt(v2 + eps)
        else:
            o_ref[...] = s12_ref[...] * inv_n


def xcorr2(x1, x2, *, zero_mean_normalized=False, eps=1e-5,
           max_tile_bytes=_DEFAULT_TILE_BYTES):
    """Normalized cross-correlation score per batch element.

    x1, x2: NCHW arrays of identical shape with C == 1. Returns shape (B,) f32.
    """
    assert x1.shape == x2.shape, f"{x1.shape} != {x2.shape}"
    b, c, h, w = x1.shape
    assert c == 1

    n = h * w * c
    el_bytes = jnp.dtype(x1.dtype).itemsize  # tile sizing at the *input* dtype

    # ---- choose tile sizes -------------------------------------------------
    rows_probe = min(b, _SUBLANE)
    if rows_probe * n * el_bytes <= max_tile_bytes:
        tw = n                                  # whole flattened row per tile
        n_pad = n
    else:
        # Chunk the flattened spatial axis in lane-aligned pieces.
        tw = max(_LANE,
                 _round_down(max_tile_bytes // (rows_probe * el_bytes), _LANE))
        n_pad = _round_up(n, tw)

    tb_fit = max(1, max_tile_bytes // (tw * el_bytes))
    if tb_fit >= b:
        tb = b                                  # full batch extent in one block
        b_pad = b
    else:
        tb = max(_SUBLANE, _round_down(tb_fit, _SUBLANE))
        b_pad = _round_up(b, tb)

    grid = (b_pad // tb, n_pad // tw)

    # ---- layout glue: flatten + zero-pad (zeros are exact for every sum) ---
    x1_f = x1.reshape(b, n)
    x2_f = x2.reshape(b, n)
    if b_pad != b or n_pad != n:
        pad = ((0, b_pad - b), (0, n_pad - n))
        x1_f = jnp.pad(x1_f, pad)
        x2_f = jnp.pad(x2_f, pad)

    n_acc = 5 if zero_mean_normalized else 1
    kernel = functools.partial(
        _xcorr2_kernel,
        zero_mean_normalized=zero_mean_normalized,
        eps=float(eps),
        inv_n=1.0 / float(n),
    )

    out = pl.pallas_call(
        kernel,
        out_shape=jax.ShapeDtypeStruct((b_pad, 1), jnp.float32),
        grid_spec=pltpu.PrefetchScalarGridSpec(
            num_scalar_prefetch=0,
            grid=grid,
            in_specs=[
                pl.BlockSpec((tb, tw), lambda i, k: (i, k)),
                pl.BlockSpec((tb, tw), lambda i, k: (i, k)),
            ],
            out_specs=pl.BlockSpec((tb, 1), lambda i, k: (i, 0)),
            scratch_shapes=[pltpu.VMEM((tb, 1), jnp.float32)
                            for _ in range(n_acc)],
        ),
        compiler_params=pltpu.CompilerParams(
            # Batch axis parallel (megacore sharding on v7x); the chunk axis
            # carries the accumulator scratch so it must stay "arbitrary".
            dimension_semantics=("parallel", "arbitrary"),
        ),
    )(x1_f, x2_f)

    return out[:b, 0]


def _xcorr2_ref(x1, x2, *, zero_mean_normalized=False, eps=1e-5):
    b, c, h, w = x1.shape
    x1 = x1.astype(jnp.float32)
    x2 = x2.astype(jnp.float32)
    if zero_mean_normalized:
        def inorm(x):
            m = jnp.mean(x, axis=(2, 3), keepdims=True)
            v = jnp.mean((x - m) ** 2, axis=(2, 3), keepdims=True)
            return (x - m) * jax.lax.rsqrt(v + eps)
        x1 = inorm(x1)
        x2 = inorm(x2)
    score = jnp.einsum("bchw,bchw->b", x1, x2)
    return score / (h * w * c)


if __name__ == "__main__":
    key = jax.random.PRNGKey(0)

    # (shape, max_tile_bytes). The tiny-budget configs force the chunked /
    # batch-tiled / zero-padded code paths without needing large arrays.
    configs = [
        ((2, 1, 16, 16), _DEFAULT_TILE_BYTES),   # single (B, H*W) block
        ((10, 1, 3, 100), 4 * 1024),             # pads B 10->16 and H*W 300->384
        ((16, 1, 32, 64), 32 * 1024),            # multi-chunk accumulation
    ]

    ok = True
    for idx, (shape, tile_bytes) in enumerate(configs):
        k1, k2 = jax.random.split(jax.random.fold_in(key, idx))
        x1 = jax.random.normal(k1, shape, dtype=jnp.float32)
        x2 = jax.random.normal(k2, shape, dtype=jnp.float32)
        for zmn in (False, True):
            out = xcorr2(x1, x2, zero_mean_normalized=zmn,
                         max_tile_bytes=tile_bytes)
            jax.block_until_ready(out)
            ref = _xcorr2_ref(x1, x2, zero_mean_normalized=zmn)
            ok = ok and bool(jnp.allclose(out, ref, atol=1e-4, rtol=1e-4))

    print("KERNEL_OK" if ok else "KERNEL_MISMATCH")
</pallas_src>

<mosaic_0001>
module attributes {stable_mosaic.version = 11 : i64} {
  func.func @_xcorr2_kernel(%arg0: i32, %arg1: i32, %arg2: memref<2x256xf32, #tpu.memory_space<vmem>>, %arg3: memref<2x256xf32, #tpu.memory_space<vmem>>, %arg4: memref<2x1xf32, #tpu.memory_space<vmem>>, %arg5: memref<2x1xf32, #tpu.memory_space<vmem>>) attributes {dimension_semantics = [#tpu.dimension_semantics<parallel>, #tpu.dimension_semantics<arbitrary>], iteration_bounds = array<i64: 1, 1>, scalar_prefetch = 0 : i64, scratch_operands = 1 : i64, tpu.core_type = #tpu.core_type<tc>, window_params = [{transform_indices = @transform_0, window_bounds = array<i64: 2, 256>}, {transform_indices = @transform_1, window_bounds = array<i64: 2, 256>}, {transform_indices = @transform_2, window_bounds = array<i64: 2, 1>}]} {
    %c0_i32 = arith.constant 0 : i32
    %0 = arith.cmpi eq, %arg1, %c0_i32 : i32
    %1 = arith.extui %0 : i1 to i32
    %c0_i32_0 = arith.constant 0 : i32
    %2 = arith.cmpi ne, %1, %c0_i32_0 : i32
    scf.if %2 {
      %cst_10 = arith.constant 0.000000e+00 : f32
      %14 = vector.broadcast %cst_10 : f32 to vector<2x1xf32>
      %c0_11 = arith.constant 0 : index
      %c0_12 = arith.constant 0 : index
      %15 = vector.load %arg5[%c0_11, %c0_12] : memref<2x1xf32, #tpu.memory_space<vmem>>, vector<2x1xf32>
      tpu.vector_store %arg5[%c0_11, %c0_12], %14 {strides = array<i32>} : memref<2x1xf32, #tpu.memory_space<vmem>>, vector<2x1xf32>,
    } else {
    }
    %c0 = arith.constant 0 : index
    %c0_1 = arith.constant 0 : index
    %3 = vector.load %arg2[%c0, %c0_1] : memref<2x256xf32, #tpu.memory_space<vmem>>, vector<2x256xf32>
    %c0_2 = arith.constant 0 : index
    %c0_3 = arith.constant 0 : index
    %4 = vector.load %arg3[%c0_2, %c0_3] : memref<2x256xf32, #tpu.memory_space<vmem>>, vector<2x256xf32>
    %c0_4 = arith.constant 0 : index
    %c0_5 = arith.constant 0 : index
    %5 = vector.load %arg5[%c0_4, %c0_5] : memref<2x1xf32, #tpu.memory_space<vmem>>, vector<2x1xf32>
    %6 = arith.mulf %3, %4 : vector<2x256xf32>
    %cst = arith.constant dense<0.000000e+00> : vector<2xf32>
    %7 = vector.multi_reduction <add>, %6, %cst [1] : vector<2x256xf32> to vector<2xf32>
    %8 = vector.shape_cast %7 : vector<2xf32> to vector<2x1xf32>
    %9 = arith.addf %5, %8 : vector<2x1xf32>
    %c0_6 = arith.constant 0 : index
    %c0_7 = arith.constant 0 : index
    %10 = vector.load %arg5[%c0_6, %c0_7] : memref<2x1xf32, #tpu.memory_space<vmem>>, vector<2x1xf32>
    tpu.vector_store %arg5[%c0_6, %c0_7], %9 {strides = array<i32>} : memref<2x1xf32, #tpu.memory_space<vmem>>, vector<2x1xf32>,
    %c0_i32_8 = arith.constant 0 : i32
    %11 = arith.cmpi eq, %arg1, %c0_i32_8 : i32
    %12 = arith.extui %11 : i1 to i32
    %c0_i32_9 = arith.constant 0 : i32
    %13 = arith.cmpi ne, %12, %c0_i32_9 : i32
    scf.if %13 {
      %c0_10 = arith.constant 0 : index
      %c0_11 = arith.constant 0 : index
      %14 = vector.load %arg5[%c0_10, %c0_11] : memref<2x1xf32, #tpu.memory_space<vmem>>, vector<2x1xf32>
      %cst_12 = arith.constant 3.906250e-03 : f32
      %15 = vector.broadcast %cst_12 : f32 to vector<2x1xf32>
      %16 = arith.mulf %14, %15 : vector<2x1xf32>
      %c0_13 = arith.constant 0 : index
      %c0_14 = arith.constant 0 : index
      %17 = vector.load %arg4[%c0_13, %c0_14] : memref<2x1xf32, #tpu.memory_space<vmem>>, vector<2x1xf32>
      tpu.vector_store %arg4[%c0_13, %c0_14], %16 {strides = array<i32>} : memref<2x1xf32, #tpu.memory_space<vmem>>, vector<2x1xf32>,
    } else {
    }
    return
  }
  func.func @transform_0(%arg0: i32, %arg1: i32) -> (i32, i32) {
    %c0_i32 = arith.constant 0 : i32
    return %arg0, %arg1 : i32, i32
  }
  func.func @transform_1(%arg0: i32, %arg1: i32) -> (i32, i32) {
    %c0_i32 = arith.constant 0 : i32
    return %arg0, %arg1 : i32, i32
  }
  func.func @transform_2(%arg0: i32, %arg1: i32) -> (i32, i32) {
    %c0_i32 = arith.constant 0 : i32
    %c0_i32_0 = arith.constant 0 : i32
    return %arg0, %c0_i32 : i32, i32
  }
}

</mosaic_0001>

<bundles_post_ra>
// kernel: tpu_custom_call.1
= control target key start
LH: loop header
LB: loop body
LE: loop exit
PB: predicated region body
PF: predicated region fallthrough
CT: control target
= control target key end

     0   :  { %7 = vsyncpa [#allocation4], 0  ;;  %s156_s0 = inlined_call_operand.hbm [shape: f32[2,256], index: 0, kind: input, shape index: {}]   ;;  %s157_s1 = inlined_call_operand.hbm [shape: f32[2,256], index: 1, kind: input, shape index: {}]   ;;  %s158_s2 = inlined_call_operand.vmem [shape: f32[2,1], index: 2, kind: output, shape index: {}]  }
   0x1   :  { %8 = vsyncpa [#allocation6], 0  ;;  %s125_s9 = smov [#allocation3]   ;;  %s126_s11 = smov [#allocation5]  }
   0x2   :  { %s15_s10 = sshll.u32 %s125_s9, 4  ;;  %s25_s12 = sshll.u32 %s126_s11, 4  ;;  %s16_s10 = int_to_ptr.vmem [resolvable:$true] %s15_s10  ;;  %s26_s12 = int_to_ptr.vmem [resolvable:$true] %s25_s12 }
   0x3   :  { %s89_s13 = scalar_lea.vmem %s16_s10, 64  ;;  %p94_p1 = scmp.lt.s32.totalorder %s16_s10, %s16_s10 }
   0x4   :  { %p90_p0 = scmp.ne.s32.totalorder %s16_s10, %s89_s13  ;;  %p95_p2 = scmp.lt.s32.totalorder %s89_s13, %s89_s13 }
   0x6   :  { %p96_p3 = por %p95_p2, %p94_p1 }
   0x8   :  { %p97_p4 = pnand %p96_p3, %p90_p0 }
   0xa   :  { %100 = shalt.err (!%p97_p4)
}
   0xb   :  { %18 = dma.hbm_to_vmem [thread:$0]  %s156_s0, 64, %s16_s10, [#allocation4]  }
   0xc   :  { %s109_s16 = scalar_lea.vmem %s26_s12, 64  ;;  %p114_p6 = scmp.lt.s32.totalorder %s26_s12, %s26_s12 }
   0xd   :  { %p110_p5 = scmp.ne.s32.totalorder %s26_s12, %s109_s16  ;;  %p115_p7 = scmp.lt.s32.totalorder %s109_s16, %s109_s16 }
   0xf   :  { %p116_p8 = por %p115_p7, %p114_p6 }
  0x11   :  { %p117_p9 = pnand %p116_p8, %p110_p5 }
  0x13   :  { %120 = shalt.err (!%p117_p9)
}
  0x14   :  { %28 = dma.hbm_to_vmem [thread:$0]  %s157_s1, 64, %s26_s12, [#allocation6]  }
  0x15   :  { %121 = dma.done.wait [#allocation4], 64  }
  0x16   :  { %122 = vsyncadd [#allocation4], 4294967232 }
  0x17   :  { %123 = dma.done.wait [#allocation6], 64  }
  0x18   :  { %124 = vsyncadd [#allocation6], 4294967232  ;;  %vm39_vm0 = vcmask 1024   ;;  %v49_v0 = vlaneseq  ;;  %v127_v1 = vmov 0.0   ;;  %v128_v2 = vmov 1983009808  }
  0x19   :  { %40 = vst.msk [vmem:[#allocation2] sm:$0x3] %vm39_vm0, %v127_v1  ;;  %v47_v3 = vunpack.c.l.s4 %v128_v2  ;;  %v41_v7 = vld [vmem:[#allocation3] sm:$0xf]  ;;  %v42_v8 = vld [vmem:[#allocation5] sm:$0xf] }
  0x1a   :  { %v50_v4 = vshrl.u32 %v49_v0, 7  ;;  %v44_v9 = vmul.f32 %v42_v8, %v41_v7  ;;  %vm56_vm1 = vcmask 1041408  }
  0x1b   :  { %v48_v5 = vunpack.c.0.s8 %v47_v3 }
  0x1d   :  { %v51_v6 = vsub.s32 %v48_v5, %v50_v4 }
  0x1f   :  { %v52_v10 = vrot.slane %v44_v9, %v51_v6 }
  0x20   :  { %v43_v15 = vld [vmem:[#allocation2] sm:$0x3] }
  0x21   :  { %v53_v11 = vcombine.high %v52_v10, %v52_v10  ;;  %v57_v12 = vsel %vm56_vm1, %v52_v10, 0.0 }
  0x23   :  { %v58_v13 = vsel %vm56_vm1, %v53_v11, 0.0 }
  0x24   :  { %v59_v14 = vadd.f32 %v58_v13, %v57_v12 }
  0x26   :  { %60 = vadd.xlane.f32.xlu0 %v59_v14 }
  0xaf   :  { %v61_v16 = vpop.xlane.xlu0 %60 }
  0xb0   :  { %v62_v17 = vadd.f32 %v61_v16, %v43_v15 }
  0xb2   :  { %64 = vst.msk [vmem:[#allocation2] sm:$0x3] %vm39_vm0, %v62_v17 }
  0xb9   :  { %v68_v18 = vld [vmem:[#allocation2] sm:$0x3] }
  0xba   :  { %v69_v19 = vmul.f32 0.00390625, %v68_v18 }
  0xbc   :  { %70 = vst.msk [vmem:[%s158_s2] sm:$0x3] %vm39_vm0, %v69_v19 }
  0xbd   :  { %75 = vsyncpa [#allocation4], 1 }
  0xbe   :  { %76 = vsyncpa [#allocation6], 1 }

</bundles_post_ra>
